<compile_context>
chip_gen: v7x
topology: tpu7x:2x2x1
jax: 0.10.0
libtpu: 0.0.40
codegen_flags: <defaults>
</compile_context>

<pallas_src>
import functools

import jax
import jax.numpy as jnp
from jax.experimental import pallas as pl
from jax.experimental.pallas import tpu as pltpu


def _round_up(x, m):
    return ((x + m - 1) // m) * m


def _tversky_stats_kernel(logits_ref, labels_ref, acc_ref, *, binary, has_pad):
    """Accumulate per-(stat, class, lane) partial sums into acc_ref.

    logits_ref: [C, R, 128]      native dtype (cast to f32 here)
    labels_ref: [R, 128]         int32/int8 class ids; -1 marks a padded pixel
    acc_ref:    [NS, C_acc, 128] f32, resident in VMEM across the row-tile axis
        multi-class (NS=3): rows = [sum p*onehot, sum p, sum onehot]
        binary      (NS=4): rows = [sum pos*(y==1), sum pos*(y==0),
                                    sum pos (valid), sum (y==1)]
    """
    j = pl.program_id(2)

    @pl.when(j == 0)
    def _init():
        acc_ref[...] = jnp.zeros_like(acc_ref)

    labels = labels_ref[...].astype(jnp.int32)                  # [R, 128]

    if binary:
        x = logits_ref[0].astype(jnp.float32)                    # [R, 128]
        # sigmoid via EUP exp + approximate reciprocal (vrcp).
        pos = pl.reciprocal(1.0 + jnp.exp(-x), approx=True)
        oh1 = (labels == 1).astype(jnp.float32)
        oh0 = (labels == 0).astype(jnp.float32)
        pos_v = jnp.where(labels >= 0, pos, 0.0) if has_pad else pos
        acc_ref[0] += jnp.sum(pos * oh1, axis=0, keepdims=True)  # [1, 128]
        acc_ref[1] += jnp.sum(pos * oh0, axis=0, keepdims=True)
        acc_ref[2] += jnp.sum(pos_v, axis=0, keepdims=True)
        acc_ref[3] += jnp.sum(oh1, axis=0, keepdims=True)
    else:
        x = logits_ref[...].astype(jnp.float32)                   # [C, R, 128]
        # Class axis is the leading (non-layout) axis: max/sum over it are
        # plain elementwise VPU ops across the C slabs.
        m = jnp.max(x, axis=0, keepdims=True)                     # [1, R, 128]
        e = jnp.exp(x - m)                                        # [C, R, 128]
        denom = jnp.sum(e, axis=0, keepdims=True)                 # [1, R, 128]
        p = e * pl.reciprocal(denom, approx=True)                 # [C, R, 128]
        class_ids = jax.lax.broadcasted_iota(jnp.int32, x.shape, 0)
        onehot = (labels[None, :, :] == class_ids).astype(jnp.float32)
        if has_pad:
            # Padded columns hold real zeros in HBM (never garbage), so p is a
            # finite 1/C there; a single select drops them from the prob sums.
            p = jnp.where((labels >= 0)[None, :, :], p, 0.0)
        # Only reduce over the row (sublane) axis; keep 128 lane partials.
        acc_ref[0] += jnp.sum(p * onehot, axis=1)                 # [C, 128]
        acc_ref[1] += jnp.sum(p, axis=1)
        acc_ref[2] += jnp.sum(onehot, axis=1)


def _tversky_stats(logits4, labels3, *, binary, has_pad, split, jsteps, r_tile):
    """logits4: [B, C, rows, 128]; labels3: [B, rows, 128].

    Returns lane-partial stats of shape [split, B, NS, C_acc, 128] (f32).
    """
    b, c, rows_padded, lanes = logits4.shape
    ns = 4 if binary else 3
    c_acc = 1 if binary else c

    kernel = functools.partial(_tversky_stats_kernel,
                               binary=binary, has_pad=has_pad)

    n_pix = b * rows_padded * lanes
    cost = pl.CostEstimate(
        flops=int((6 if binary else 10 * c) * n_pix),
        transcendentals=int(((1 if binary else c) + 1) * n_pix),
        bytes_accessed=int(logits4.size * logits4.dtype.itemsize
                           + labels3.size * labels3.dtype.itemsize
                           + split * b * ns * c_acc * lanes * 4),
    )

    return pl.pallas_call(
        kernel,
        out_shape=jax.ShapeDtypeStruct((split, b, ns, c_acc, lanes),
                                       jnp.float32),
        grid=(split, b, jsteps),
        in_specs=[
            pl.BlockSpec((None, c, r_tile, lanes),
                         lambda s, bi, j: (bi, 0, s * jsteps + j, 0)),
            pl.BlockSpec((None, r_tile, lanes),
                         lambda s, bi, j: (bi, s * jsteps + j, 0)),
        ],
        out_specs=pl.BlockSpec((None, None, ns, c_acc, lanes),
                               lambda s, bi, j: (s, bi, 0, 0, 0)),
        compiler_params=pltpu.CompilerParams(
            dimension_semantics=("parallel", "parallel", "arbitrary"),
            vmem_limit_bytes=32 * 1024 * 1024),
        cost_estimate=cost,
    )(logits4, labels3)


@functools.partial(jax.jit,
                   static_argnames=("alpha", "beta", "eps", "block_rows"))
def tversky_loss(logits, true, alpha=0.5, beta=0.5, eps=1e-07, block_rows=None):
    """JAX/Pallas equivalent of TverskyLoss.forward.

    logits: [B, C, H, W] float (any float dtype; cast to f32 per tile)
    true:   [B, 1, H, W] or [B, H, W] integer labels
    """
    b, c, h, w = logits.shape
    hw = h * w
    binary = (c == 1)

    labels = true[:, 0, :, :] if true.ndim == 4 else true
    labels = labels.reshape(b, hw)
    logits3 = logits.reshape(b, c, hw)                    # free reshape

    # --- row tiling: 1 row = 128 pixels (lane dim). Scale rows/tile with C so
    # f32 temporaries stay small (v7x has only 64 MiB VMEM). ---
    rows = pl.cdiv(hw, 128)
    if block_rows is not None:
        r_nominal = _round_up(int(block_rows), 8)
    else:
        r_nominal = max(32, min(1024, (2048 // c) // 32 * 32))

    if rows <= r_nominal:
        r_tile = _round_up(rows, 8)            # single block per batch
        split, jsteps = 1, 1
    else:
        r_tile = r_nominal
        split = 2 if b == 1 else 1             # v7x: both TCs when B == 1
        jsteps = pl.cdiv(rows, split * r_tile)
    rows_padded = split * jsteps * r_tile
    hw_padded = rows_padded * 128
    pad = hw_padded - hw
    has_pad = pad > 0

    if has_pad:
        # Materialise the padded copy: zeros for logits, -1 sentinel labels.
        logits3 = jnp.pad(logits3, ((0, 0), (0, 0), (0, pad)))
        # When a label copy is written anyway, write it narrow (1 B/pixel).
        use_int8 = (c <= 128) and (r_tile % 32 == 0)
        lab_dtype = jnp.int8 if use_int8 else jnp.int32
        labels = jnp.pad(labels.astype(lab_dtype), ((0, 0), (0, pad)),
                         constant_values=-1)
    else:
        labels = labels.astype(jnp.int32)

    logits4 = logits3.reshape(b, c, rows_padded, 128)
    labels3 = labels.reshape(b, rows_padded, 128)

    out = _tversky_stats(logits4, labels3, binary=binary, has_pad=has_pad,
                         split=split, jsteps=jsteps, r_tile=r_tile)

    if binary:
        s = jnp.sum(out, axis=(0, 1, 3, 4))               # [4]
        inter_pos, pos_oh0, psum_pos, cnt1 = s[0], s[1], s[2], s[3]
        total = jnp.asarray(b * hw, jnp.float32)          # real (unpadded) pixels
        cnt0 = total - cnt1
        # probas rows = [sigmoid, 1-sigmoid]; onehot rows = [y==1, y==0]
        inter = jnp.stack([inter_pos, cnt0 - pos_oh0])
        psum = jnp.stack([psum_pos, total - psum_pos])
        cnt = jnp.stack([cnt1, cnt0])
    else:
        stats = jnp.sum(out, axis=(0, 1, 4))              # [3, C]
        inter, psum, cnt = stats[0], stats[1], stats[2]

    fps = psum - inter                                     # sum p*(1-onehot)
    fns = cnt - inter                                      # sum (1-p)*onehot
    tversky = jnp.mean(inter / (inter + alpha * fps + beta * fns + eps))
    return 1.0 - tversky


def _reference(logits, true, alpha=0.5, beta=0.5, eps=1e-07):
    """Pure-JAX reference mirroring the PyTorch code (both paths)."""
    c = logits.shape[1]
    labels = true[:, 0, :, :] if true.ndim == 4 else true
    x = logits.astype(jnp.float32)
    if c == 1:
        pos = jax.nn.sigmoid(x)
        probas = jnp.concatenate([pos, 1.0 - pos], axis=1)
        one_hot = jnp.stack(
            [(labels == 1), (labels == 0)], axis=1).astype(jnp.float32)
    else:
        probas = jax.nn.softmax(x, axis=1)
        one_hot = jnp.transpose(
            jax.nn.one_hot(labels, c, dtype=jnp.float32), (0, 3, 1, 2))
    dims = (0, 2, 3)
    inter = jnp.sum(probas * one_hot, dims)
    fps = jnp.sum(probas * (1.0 - one_hot), dims)
    fns = jnp.sum((1.0 - probas) * one_hot, dims)
    t = jnp.mean(inter / (inter + alpha * fps + beta * fns + eps))
    return 1.0 - t


if __name__ == "__main__":
    key = jax.random.PRNGKey(0)
    keys = jax.random.split(key, 8)

    # 1) Multi-class, f32, single row-tile per batch.
    B, C, H, W = 2, 4, 16, 16
    logits = jax.random.normal(keys[0], (B, C, H, W), dtype=jnp.float32)
    true = jax.random.randint(keys[1], (B, 1, H, W), 0, C, dtype=jnp.int32)
    loss = jax.block_until_ready(tversky_loss(logits, true))
    ref = _reference(logits, true)
    assert jnp.allclose(loss, ref, atol=1e-3, rtol=1e-3), (loss, ref)

    # 2) Binary (C == 1) path.
    logits_b = jax.random.normal(keys[2], (B, 1, H, W), dtype=jnp.float32)
    true_b = jax.random.randint(keys[3], (B, 1, H, W), 0, 2, dtype=jnp.int32)
    loss_b = jax.block_until_ready(tversky_loss(logits_b, true_b))
    ref_b = _reference(logits_b, true_b)
    assert jnp.allclose(loss_b, ref_b, atol=1e-3, rtol=1e-3), (loss_b, ref_b)

    # 3) bf16 logits, multi-step reduction with a padded remainder and int8
    #    labels (block_rows forced down so the pipelined path is exercised).
    H2 = W2 = 80
    logits_m = jax.random.normal(keys[4], (B, C, H2, W2), dtype=jnp.bfloat16)
    true_m = jax.random.randint(keys[5], (B, 1, H2, W2), 0, C, dtype=jnp.int32)
    loss_m = jax.block_until_ready(tversky_loss(logits_m, true_m, block_rows=32))
    ref_m = _reference(logits_m, true_m)
    assert jnp.allclose(loss_m, ref_m, atol=2e-3, rtol=2e-3), (loss_m, ref_m)

    # 4) B == 1: pixel axis split across both TensorCores; labels as [B, H, W].
    logits_s = jax.random.normal(keys[6], (1, 3, H2, W2), dtype=jnp.float32)
    true_s = jax.random.randint(keys[7], (1, H2, W2), 0, 3, dtype=jnp.int32)
    loss_s = jax.block_until_ready(tversky_loss(logits_s, true_s, block_rows=32))
    ref_s = _reference(logits_s, true_s)
    assert jnp.allclose(loss_s, ref_s, atol=1e-3, rtol=1e-3), (loss_s, ref_s)

    print("KERNEL_OK")
</pallas_src>

<mosaic_0001>
module attributes {stable_mosaic.version = 11 : i64} {
  func.func @_tversky_stats_kernel(%arg0: i32, %arg1: i32, %arg2: i32, %arg3: memref<1x4x8x128xf32, #tpu.memory_space<vmem>>, %arg4: memref<1x8x128xi32, #tpu.memory_space<vmem>>, %arg5: memref<1x1x3x4x128xf32, #tpu.memory_space<vmem>>) attributes {dimension_semantics = [#tpu.dimension_semantics<parallel>, #tpu.dimension_semantics<parallel>, #tpu.dimension_semantics<arbitrary>], iteration_bounds = array<i64: 1, 2, 1>, scalar_prefetch = 0 : i64, scratch_operands = 0 : i64, tpu.core_type = #tpu.core_type<tc>, window_params = [{transform_indices = @transform_0, window_bounds = array<i64: 1, 4, 8, 128>}, {transform_indices = @transform_1, window_bounds = array<i64: 1, 8, 128>}, {transform_indices = @transform_2, window_bounds = array<i64: 1, 1, 3, 4, 128>}]} {
    %c0_i32 = arith.constant 0 : i32
    %0 = arith.cmpi eq, %arg2, %c0_i32 : i32
    %1 = arith.extui %0 : i1 to i32
    %c0_i32_0 = arith.constant 0 : i32
    %2 = arith.cmpi ne, %1, %c0_i32_0 : i32
    scf.if %2 {
      %cst_41 = arith.constant 0.000000e+00 : f32
      %52 = vector.broadcast %cst_41 : f32 to vector<3x4x128xf32>
      %c0_42 = arith.constant 0 : index
      %c0_43 = arith.constant 0 : index
      %c0_44 = arith.constant 0 : index
      %c0_45 = arith.constant 0 : index
      %c0_46 = arith.constant 0 : index
      %53 = vector.load %arg5[%c0_42, %c0_43, %c0_44, %c0_45, %c0_46] : memref<1x1x3x4x128xf32, #tpu.memory_space<vmem>>, vector<1x1x3x4x128xf32>
      %54 = vector.shape_cast %53 : vector<1x1x3x4x128xf32> to vector<3x4x128xf32>
      %55 = vector.shape_cast %52 : vector<3x4x128xf32> to vector<1x1x3x4x128xf32>
      tpu.vector_store %arg5[%c0_42, %c0_43, %c0_44, %c0_45, %c0_46], %55 {strides = array<i32>} : memref<1x1x3x4x128xf32, #tpu.memory_space<vmem>>, vector<1x1x3x4x128xf32>,
    } else {
    }
    %c0 = arith.constant 0 : index
    %c0_1 = arith.constant 0 : index
    %c0_2 = arith.constant 0 : index
    %3 = vector.load %arg4[%c0, %c0_1, %c0_2] : memref<1x8x128xi32, #tpu.memory_space<vmem>>, vector<1x8x128xi32>
    %4 = vector.shape_cast %3 : vector<1x8x128xi32> to vector<8x128xi32>
    %c0_3 = arith.constant 0 : index
    %c0_4 = arith.constant 0 : index
    %c0_5 = arith.constant 0 : index
    %c0_6 = arith.constant 0 : index
    %5 = vector.load %arg3[%c0_3, %c0_4, %c0_5, %c0_6] : memref<1x4x8x128xf32, #tpu.memory_space<vmem>>, vector<1x4x8x128xf32>
    %6 = vector.shape_cast %5 : vector<1x4x8x128xf32> to vector<4x8x128xf32>
    %cst = arith.constant dense<0xFF800000> : vector<8x128xf32>
    %7 = vector.multi_reduction <maximumf>, %6, %cst [0] : vector<4x8x128xf32> to vector<8x128xf32>
    %8 = vector.shape_cast %7 : vector<8x128xf32> to vector<1x8x128xf32>
    %9 = vector.broadcast %8 : vector<1x8x128xf32> to vector<4x8x128xf32>
    %10 = arith.subf %6, %9 : vector<4x8x128xf32>
    %11 = math.exp %10 : vector<4x8x128xf32>
    %cst_7 = arith.constant dense<0.000000e+00> : vector<8x128xf32>
    %12 = vector.multi_reduction <add>, %11, %cst_7 [0] : vector<4x8x128xf32> to vector<8x128xf32>
    %13 = vector.shape_cast %12 : vector<8x128xf32> to vector<1x8x128xf32>
    %14 = tpu.reciprocal %13 {approx = true} : vector<1x8x128xf32> -> vector<1x8x128xf32>
    %15 = vector.broadcast %14 : vector<1x8x128xf32> to vector<4x8x128xf32>
    %16 = arith.mulf %11, %15 : vector<4x8x128xf32>
    %17 = tpu.iota {dimensions = array<i32: 0>} : vector<4x8x128xi32>
    %18 = vector.shape_cast %4 : vector<8x128xi32> to vector<1x8x128xi32>
    %19 = vector.broadcast %18 : vector<1x8x128xi32> to vector<4x8x128xi32>
    %20 = arith.cmpi eq, %19, %17 : vector<4x8x128xi32>
    %21 = arith.extui %20 : vector<4x8x128xi1> to vector<4x8x128xi32>
    %22 = arith.sitofp %21 : vector<4x8x128xi32> to vector<4x8x128xf32>
    %c0_i32_8 = arith.constant 0 : i32
    %23 = vector.broadcast %c0_i32_8 : i32 to vector<8x128xi32>
    %24 = arith.cmpi sge, %4, %23 : vector<8x128xi32>
    %25 = vector.shape_cast %24 : vector<8x128xi1> to vector<1x8x128xi1>
    %cst_9 = arith.constant 0.000000e+00 : f32
    %26 = vector.shape_cast %25 : vector<1x8x128xi1> to vector<1x8x128xi1>
    %27 = vector.broadcast %26 : vector<1x8x128xi1> to vector<4x8x128xi1>
    %28 = vector.broadcast %cst_9 : f32 to vector<4x8x128xf32>
    %29 = arith.select %27, %16, %28 : vector<4x8x128xi1>, vector<4x8x128xf32>
    %c0_10 = arith.constant 0 : index
    %c0_11 = arith.constant 0 : index
    %c0_12 = arith.constant 0 : index
    %c0_13 = arith.constant 0 : index
    %c0_14 = arith.constant 0 : index
    %30 = vector.load %arg5[%c0_10, %c0_11, %c0_12, %c0_13, %c0_14] : memref<1x1x3x4x128xf32, #tpu.memory_space<vmem>>, vector<1x1x1x4x128xf32>
    %31 = vector.shape_cast %30 : vector<1x1x1x4x128xf32> to vector<4x128xf32>
    %32 = arith.mulf %29, %22 : vector<4x8x128xf32>
    %cst_15 = arith.constant dense<0.000000e+00> : vector<4x128xf32>
    %33 = vector.multi_reduction <add>, %32, %cst_15 [1] : vector<4x8x128xf32> to vector<4x128xf32>
    %34 = arith.addf %31, %33 : vector<4x128xf32>
    %c0_16 = arith.constant 0 : index
    %c0_17 = arith.constant 0 : index
    %c0_18 = arith.constant 0 : index
    %c0_19 = arith.constant 0 : index
    %c0_20 = arith.constant 0 : index
    %35 = vector.load %arg5[%c0_16, %c0_17, %c0_18, %c0_19, %c0_20] : memref<1x1x3x4x128xf32, #tpu.memory_space<vmem>>, vector<1x1x1x4x128xf32>
    %36 = vector.shape_cast %35 : vector<1x1x1x4x128xf32> to vector<4x128xf32>
    %37 = vector.shape_cast %34 : vector<4x128xf32> to vector<1x1x1x4x128xf32>
    tpu.vector_store %arg5[%c0_16, %c0_17, %c0_18, %c0_19, %c0_20], %37 {strides = array<i32>} : memref<1x1x3x4x128xf32, #tpu.memory_space<vmem>>, vector<1x1x1x4x128xf32>,
    %c0_21 = arith.constant 0 : index
    %c0_22 = arith.constant 0 : index
    %c1 = arith.constant 1 : index
    %c0_23 = arith.constant 0 : index
    %c0_24 = arith.constant 0 : index
    %38 = vector.load %arg5[%c0_21, %c0_22, %c1, %c0_23, %c0_24] : memref<1x1x3x4x128xf32, #tpu.memory_space<vmem>>, vector<1x1x1x4x128xf32>
    %39 = vector.shape_cast %38 : vector<1x1x1x4x128xf32> to vector<4x128xf32>
    %cst_25 = arith.constant dense<0.000000e+00> : vector<4x128xf32>
    %40 = vector.multi_reduction <add>, %29, %cst_25 [1] : vector<4x8x128xf32> to vector<4x128xf32>
    %41 = arith.addf %39, %40 : vector<4x128xf32>
    %c0_26 = arith.constant 0 : index
    %c0_27 = arith.constant 0 : index
    %c1_28 = arith.constant 1 : index
    %c0_29 = arith.constant 0 : index
    %c0_30 = arith.constant 0 : index
    %42 = vector.load %arg5[%c0_26, %c0_27, %c1_28, %c0_29, %c0_30] : memref<1x1x3x4x128xf32, #tpu.memory_space<vmem>>, vector<1x1x1x4x128xf32>
    %43 = vector.shape_cast %42 : vector<1x1x1x4x128xf32> to vector<4x128xf32>
    %44 = vector.shape_cast %41 : vector<4x128xf32> to vector<1x1x1x4x128xf32>
    tpu.vector_store %arg5[%c0_26, %c0_27, %c1_28, %c0_29, %c0_30], %44 {strides = array<i32>} : memref<1x1x3x4x128xf32, #tpu.memory_space<vmem>>, vector<1x1x1x4x128xf32>,
    %c0_31 = arith.constant 0 : index
    %c0_32 = arith.constant 0 : index
    %c2 = arith.constant 2 : index
    %c0_33 = arith.constant 0 : index
    %c0_34 = arith.constant 0 : index
    %45 = vector.load %arg5[%c0_31, %c0_32, %c2, %c0_33, %c0_34] : memref<1x1x3x4x128xf32, #tpu.memory_space<vmem>>, vector<1x1x1x4x128xf32>
    %46 = vector.shape_cast %45 : vector<1x1x1x4x128xf32> to vector<4x128xf32>
    %cst_35 = arith.constant dense<0.000000e+00> : vector<4x128xf32>
    %47 = vector.multi_reduction <add>, %22, %cst_35 [1] : vector<4x8x128xf32> to vector<4x128xf32>
    %48 = arith.addf %46, %47 : vector<4x128xf32>
    %c0_36 = arith.constant 0 : index
    %c0_37 = arith.constant 0 : index
    %c2_38 = arith.constant 2 : index
    %c0_39 = arith.constant 0 : index
    %c0_40 = arith.constant 0 : index
    %49 = vector.load %arg5[%c0_36, %c0_37, %c2_38, %c0_39, %c0_40] : memref<1x1x3x4x128xf32, #tpu.memory_space<vmem>>, vector<1x1x1x4x128xf32>
    %50 = vector.shape_cast %49 : vector<1x1x1x4x128xf32> to vector<4x128xf32>
    %51 = vector.shape_cast %48 : vector<4x128xf32> to vector<1x1x1x4x128xf32>
    tpu.vector_store %arg5[%c0_36, %c0_37, %c2_38, %c0_39, %c0_40], %51 {strides = array<i32>} : memref<1x1x3x4x128xf32, #tpu.memory_space<vmem>>, vector<1x1x1x4x128xf32>,
    return
  }
  func.func @transform_0(%arg0: i32, %arg1: i32, %arg2: i32) -> (i32, i32, i32, i32) {
    %c1_i32 = arith.constant 1 : i32
    %0 = arith.muli %arg0, %c1_i32 : i32
    %1 = arith.addi %0, %arg2 : i32
    %c0_i32 = arith.constant 0 : i32
    %c0_i32_0 = arith.constant 0 : i32
    %c0_i32_1 = arith.constant 0 : i32
    return %arg1, %c0_i32, %1, %c0_i32_0 : i32, i32, i32, i32
  }
  func.func @transform_1(%arg0: i32, %arg1: i32, %arg2: i32) -> (i32, i32, i32) {
    %c1_i32 = arith.constant 1 : i32
    %0 = arith.muli %arg0, %c1_i32 : i32
    %1 = arith.addi %0, %arg2 : i32
    %c0_i32 = arith.constant 0 : i32
    %c0_i32_0 = arith.constant 0 : i32
    return %arg1, %1, %c0_i32 : i32, i32, i32
  }
  func.func @transform_2(%arg0: i32, %arg1: i32, %arg2: i32) -> (i32, i32, i32, i32, i32) {
    %c0_i32 = arith.constant 0 : i32
    %c0_i32_0 = arith.constant 0 : i32
    %c0_i32_1 = arith.constant 0 : i32
    %c0_i32_2 = arith.constant 0 : i32
    return %arg0, %arg1, %c0_i32, %c0_i32_0, %c0_i32_1 : i32, i32, i32, i32, i32
  }
}

</mosaic_0001>

<bundles_post_ra>
// kernel: squeeze.4
= control target key start
LH: loop header
LB: loop body
LE: loop exit
PB: predicated region body
PF: predicated region fallthrough
CT: control target
= control target key end

     0   :  { %s8_s6 = smov 3  ;;  %s11_s7 = smov 12  ;;  %vm13_vm0 = vcmask 1043458   ;;  %vm3_vm1 = vcmask 130048   ;;  %vm17_vm2 = vcmask 1048448   ;;  %vm31_vm3 = vcmask 917248   ;;  %s213_s0 = inlined_call_operand.vmem [shape: s32[2,1,16,16], index: 0, kind: input, shape index: {}]   ;;  %s214_s1 = inlined_call_operand.vmem [shape: s32[2,256], index: 1, kind: output, shape index: {}]  }
   0x1   :  { %v116_v0 = vld [vmem:[%s213_s0 + $0x7] ss:$16 sm:%s8_s6]   ;;  %v117_v1 = vld [vmem:[%s213_s0 - $0x11] ss:$16 sm:%s11_s7]   ;;  %s36_s12 = smov 3  ;;  %s39_s15 = smov 12 }
   0x2   :  { %v14_v2 = vsel %vm13_vm0, %v117_v1, %v116_v0  ;;  %v120_v3 = vld [vmem:[%s213_s0 + $0x5] ss:$16 sm:%s36_s12]   ;;  %s138_s16 = smov 112   ;;  %v121_v4 = vld [vmem:[%s213_s0 - $0x13] ss:$16 sm:%s39_s15]   ;;  %s22_s19 = smov 3 }
   0x3   :  { %15 = vrot.lane.b32.xlu0 %v14_v2, %s138_s16  ;;  %s25_s20 = smov 12  ;;  %v42_v5 = vsel %vm13_vm0, %v121_v4, %v120_v3  ;;  %v118_v6 = vld [vmem:[%s213_s0 + $0x6] ss:$16 sm:%s22_s19]   ;;  %s50_s25 = smov 3  ;;  %vm45_vm4 = vcmask 786048   ;;  %vm59_vm5 = vcmask 654848  }
   0x4   :  { %v119_v7 = vld [vmem:[%s213_s0 - $0x12] ss:$16 sm:%s25_s20]   ;;  %s139_s26 = smov 80   ;;  %v122_v9 = vld [vmem:[%s213_s0 + $0x4] ss:$16 sm:%s50_s25]   ;;  %s53_s29 = smov 12 }
   0x5   :  { %43 = vrot.lane.b32.xlu1 %v42_v5, %s139_s26  ;;  %v28_v8 = vsel %vm13_vm0, %v119_v7, %v118_v6  ;;  %v123_v10 = vld [vmem:[%s213_s0 - $0x14] ss:$16 sm:%s53_s29]   ;;  %s64_s3 = smov 3  ;;  %s67_s4 = smov 12  ;;  %vm73_vm6 = vcmask 523648   ;;  %vm87_vm7 = vcmask 392448  }
   0x6   :  { %s140_s5 = smov 96   ;;  %v56_v11 = vsel %vm13_vm0, %v123_v10, %v122_v9  ;;  %v124_v12 = vld [vmem:[%s213_s0 + $0x3] ss:$16 sm:%s64_s3]   ;;  %s78_s8 = smov 3  ;;  %v125_v13 = vld [vmem:[%s213_s0 - $0x15] ss:$16 sm:%s67_s4]  }
   0x7   :  { %29 = vrot.lane.b32.xlu0 %v28_v8, %s140_s5  ;;  %v126_v14 = vld [vmem:[%s213_s0 + $0x2] ss:$16 sm:%s78_s8]   ;;  %s81_s13 = smov 12  ;;  %s141_s14 = smov 64   ;;  %v70_v15 = vsel %vm13_vm0, %v125_v13, %v124_v12  ;;  %vm101_vm8 = vcmask 261248  }
   0x8   :  { %v127_v16 = vld [vmem:[%s213_s0 - $0x16] ss:$16 sm:%s81_s13]   ;;  %s92_s17 = smov 3  ;;  %s95_s18 = smov 12 }
   0x9   :  { %57 = vrot.lane.b32.xlu1 %v56_v11, %s141_s14  ;;  %v84_v17 = vsel %vm13_vm0, %v127_v16, %v126_v14  ;;  %v128_v18 = vld [vmem:[%s213_s0 + $0x1] ss:$16 sm:%s92_s17]   ;;  %s142_s23 = smov 48   ;;  %v2_v20 = vld [vmem:[%s213_s0] ss:$8 sm:$0xf]  }
   0xa   :  { %v129_v19 = vld [vmem:[%s213_s0 - $0x17] ss:$16 sm:%s95_s18]   ;;  %4 = vst.msk [vmem:[#allocation0] ss:$8 sm:$0x3] %vm3_vm1, %v2_v20   ;;  %s143_s0 = smov 32  }
   0xb   :  { %71 = vrot.lane.b32.xlu0 %v70_v15, %s142_s23  ;;  %v98_v21 = vsel %vm13_vm0, %v129_v19, %v128_v18  ;;  %6 = vst.msk [vmem:[#allocation0 - $0xf] ss:$8 sm:$0xc] %vm3_vm1, %v2_v20   ;;  %s144_s26 = smov 16  }
   0xd   :  { %85 = vrot.lane.b32.xlu1 %v84_v17, %s143_s0 }
   0xf   :  { %99 = vrot.lane.b32.xlu0 %v98_v21, %s144_s26 }
  0x75   :  { %v16_v22 = vpop.permute.xlu0 %15  }
  0x76   :  { %18 = vst.msk [vmem:[#allocation0] sm:$0x3] %vm17_vm2, %v16_v22   ;;  %20 = vst.msk [vmem:[#allocation0 + $0x6] sm:$0xc] %vm17_vm2, %v16_v22  }
  0x77   :  { %v44_v23 = vpop.permute.xlu1 %43  }
  0x79   :  { %v30_v24 = vpop.permute.xlu0 %29  }
  0x7a   :  { %32 = vst.msk [vmem:[#allocation0] sm:$0x3] %vm31_vm3, %v30_v24   ;;  %34 = vst.msk [vmem:[#allocation0 + $0x6] sm:$0xc] %vm31_vm3, %v30_v24  }
  0x7b   :  { %46 = vst.msk [vmem:[#allocation0] sm:$0x3] %vm45_vm4, %v44_v23   ;;  %48 = vst.msk [vmem:[#allocation0 + $0x6] sm:$0xc] %vm45_vm4, %v44_v23   ;;  %v58_v25 = vpop.permute.xlu1 %57  }
  0x7c   :  { %60 = vst.msk [vmem:[#allocation0] sm:$0x3] %vm59_vm5, %v58_v25   ;;  %62 = vst.msk [vmem:[#allocation0 + $0x6] sm:$0xc] %vm59_vm5, %v58_v25  }
  0x7d   :  { %v72_v26 = vpop.permute.xlu0 %71  }
  0x7e   :  { %74 = vst.msk [vmem:[#allocation0] sm:$0x3] %vm73_vm6, %v72_v26   ;;  %76 = vst.msk [vmem:[#allocation0 + $0x6] sm:$0xc] %vm73_vm6, %v72_v26  }
  0x7f   :  { %v86_v27 = vpop.permute.xlu1 %85  }
  0x80   :  { %88 = vst.msk [vmem:[#allocation0] sm:$0x3] %vm87_vm7, %v86_v27   ;;  %90 = vst.msk [vmem:[#allocation0 + $0x6] sm:$0xc] %vm87_vm7, %v86_v27  }
  0x81   :  { %v100_v28 = vpop.permute.xlu0 %99  }
  0x82   :  { %102 = vst.msk [vmem:[#allocation0] sm:$0x3] %vm101_vm8, %v100_v28   ;;  %104 = vst.msk [vmem:[#allocation0 + $0x6] sm:$0xc] %vm101_vm8, %v100_v28  }
  0x89   :  { %v108_v29 = vld [vmem:[#allocation0] sm:$0x3]  ;;  %v112_v30 = vld [vmem:[#allocation0 + $0x8] sm:$0x3] }
  0x8a   :  { %110 = vst [vmem:[%s214_s1] sm:$0x3] %v108_v29  ;;  %130 = vst [vmem:[%s214_s1 + $0x2] sm:$0x3] %v112_v30 }

// kernel: tversky_loss.1
= control target key start
LH: loop header
LB: loop body
LE: loop exit
PB: predicated region body
PF: predicated region fallthrough
CT: control target
= control target key end

     0   :  { %s597_s9 = smov 0   ;;  %s599_s10 = smov 0   ;;  %s680_s0 = inlined_call_operand.vmem [shape: f32[2,4,8,128], index: 0, kind: input, shape index: {}]   ;;  %s681_s1 = inlined_call_operand.vmem [shape: s32[2,8,128], index: 1, kind: input, shape index: {}]   ;;  %s682_s2 = inlined_call_operand.vmem [shape: f32[1,2,3,4,128], index: 2, kind: output, shape index: {}]  }
   0x1   :  { %s601_s11 = smov 0  }
   0x2 LB: > { %s27_s12 = sadd.s32 1, %s575_s10  ;;  %p505_p0 = scmp.ge.s32.totalorder %s579_s11, 1  ;;  %s579_s11 = sphi %s601_s11, %s12_s11   ;;  %s575_s10 = sphi %s599_s10, %s684_s10   ;;  %s571_s9 = sphi %s597_s9, %s683_s9  }
   0x3   : > { %p29_p1 = scmp.ge.s32.totalorder %s27_s12, 2  ;;  %p160_p2 = scmp.lt.s32.totalorder %s579_s11, 3 }
   0x5   : > { %s686_s12 = smov (%p29_p1, %s27_s12), 0  ;;  %p161_p3 = pnand %p505_p0, %p160_p2 }
   0x6   : > { %p199_p4 = scmp.lt.s32.totalorder (!%p161_p3), %s571_s9, 1  ;;  %v581_v3 = vmov (!%p161_p3), 0.0   ;;  %vm313_vm4 = vcmask (!%p161_p3), 1041409   ;;  %vm315_vm5 = vcmask (!%p161_p3), 1042434   ;;  %vm317_vm6 = vcmask (!%p161_p3), 1043459  }
   0x7   : > { %164 = sbr.rel (%p161_p3) target bundleno = 79 (0x4f), region = 28 }
   0xe   : > { %s688_s9 = smov (!%p199_p4, %s571_s9), 1 }
   0xf   : > { %s520_s13 = sshll.u32 %s688_s9, 5  ;;  %s521_s14 = smul.u32 12, %s688_s9 }
  0x10   : > { %s206_s17 = scalar_lea.vmem %s680_s0, %s520_s13  ;;  %s508_s18 = sshll.u32 %s688_s9, 3 }
  0x11   : > { %s621_s21 = scalar_lea.vmem %s682_s2, %s521_s14  ;;  %v234_v0 = vld [vmem:[%s206_s17] sm:$0xff]  ;;  %v235_v1 = vld [vmem:[%s206_s17 + $0x8] sm:$0xff]  ;;  %v236_v2 = vld [vmem:[%s206_s17 + $0x10] sm:$0xff]  ;;  %s215_s24 = scalar_lea.vmem %s681_s1, %s508_s18 }
  0x12   : > { %230 = vst [vmem:[%s621_s21] sm:$0xf] %v581_v3  ;;  %v238_v4 = vmax.f32 %v234_v0, %v235_v1  ;;  %231 = vst [vmem:[%s621_s21 + $0x4] sm:$0xf] %v581_v3  ;;  %v629_v5 = vld [vmem:[%s215_s24] sm:$0xff]  ;;  %v237_v6 = vld [vmem:[%s206_s17 + $0x18] sm:$0xff] }
  0x13   : > { %232 = vst [vmem:[%s621_s21 + $0x8] sm:$0xf] %v581_v3  ;;  %v239_v7 = vmax.f32 %v236_v2, %v237_v6  ;;  %vm261_vm0 = vcmp.eq.s32.totalorder %v629_v5, 0  ;;  %vm262_vm1 = vcmp.eq.s32.totalorder %v629_v5, 1  ;;  %vm263_vm2 = vcmp.eq.s32.totalorder %v629_v5, 2 }
  0x14   : > { %vm264_vm3 = vcmp.eq.s32.totalorder %v629_v5, 3  ;;  %v635_v8 = vsel %vm261_vm0, 1.0, %v581_v3  ;;  %v637_v9 = vsel %vm262_vm1, 1.0, %v581_v3  ;;  %v639_v11 = vsel %vm263_vm2, 1.0, %v581_v3 }
  0x15   : > { %v240_v10 = vmax.f32 %v238_v4, %v239_v7  ;;  %v641_v12 = vsel %vm264_vm3, 1.0, %v581_v3  ;;  %v360_v13 = vrot.slane %v635_v8, 4  ;;  %v366_v14 = vrot.slane %v637_v9, 4 }
  0x16   : > { %v372_v15 = vrot.slane %v639_v11, 4  ;;  %v378_v16 = vrot.slane %v641_v12, 4  ;;  %vm273_vm7 = vcmp.ge.s32.totalorder %v629_v5, 0 }
  0x17   : > { %v241_v17 = vsub.f32 %v234_v0, %v240_v10  ;;  %v242_v18 = vsub.f32 %v235_v1, %v240_v10  ;;  %v243_v19 = vsub.f32 %v236_v2, %v240_v10  ;;  %v244_v20 = vsub.f32 %v237_v6, %v240_v10 }
  0x18   : > { %v361_v21 = vadd.f32 %v635_v8, %v360_v13  ;;  %v367_v22 = vadd.f32 %v637_v9, %v366_v14  ;;  %v373_v23 = vadd.f32 %v639_v11, %v372_v15  ;;  %v379_v24 = vadd.f32 %v641_v12, %v378_v16 }
  0x19   : > { %v245_v25 = vmul.f32 1.442695, %v241_v17  ;;  %v247_v26 = vmul.f32 1.442695, %v242_v18  ;;  %v249_v27 = vmul.f32 1.442695, %v243_v19 }
  0x1a   : > { %v251_v28 = vmul.f32 1.442695, %v244_v20  ;;  %v362_v29 = vrot.slane %v361_v21, 2  ;;  %v368_v30 = vrot.slane %v367_v22, 2  ;;  %v374_v31 = vrot.slane %v373_v23, 2 }
  0x1b   : > { %547 = vpow2.f32 %v245_v25  ;;  %v380_v32 = vrot.slane %v379_v24, 2  ;;  %v516_v45 = vld [vmem:[%s621_s21 + $0x8] sm:$0xf] }
  0x1c   : > { %549 = vpow2.f32 %v247_v26  ;;  %v363_v33 = vadd.f32 %v362_v29, %v361_v21  ;;  %v369_v34 = vadd.f32 %v368_v30, %v367_v22  ;;  %v375_v35 = vadd.f32 %v374_v31, %v373_v23 }
  0x1d   : > { %551 = vpow2.f32 %v249_v27  ;;  %v381_v36 = vadd.f32 %v380_v32, %v379_v24 }
  0x1e   : > { %553 = vpow2.f32 %v251_v28  ;;  %v364_v37 = vrot.slane %v363_v33, 1  ;;  %v370_v38 = vrot.slane %v369_v34, 1  ;;  %v376_v39 = vrot.slane %v375_v35, 1 }
  0x1f   : > { %v382_v40 = vrot.slane %v381_v36, 1 }
  0x20   : > { %v365_v41 = vadd.f32 %v364_v37, %v363_v33  ;;  %v371_v42 = vadd.f32 %v370_v38, %v369_v34  ;;  %v377_v43 = vadd.f32 %v376_v39, %v375_v35 }
  0x21   : > { %v383_v44 = vadd.f32 %v382_v40, %v381_v36 }
  0x22   : > { %v388_v46 = vsel %vm313_vm4, %v371_v42, %v365_v41 }
  0x23   : > { %v389_v47 = vsel %vm315_vm5, %v377_v43, %v388_v46 }
  0x24   : > { %v390_v49 = vsel %vm317_vm6, %v383_v44, %v389_v47 }
  0x25   : > { %v548_v48 = vpop.eup %547  ;;  %v392_v51 = vadd.f32 %v516_v45, %v390_v49 }
  0x26   : > { %v550_v50 = vpop.eup %549 }
  0x27   : > { %v552_v52 = vpop.eup %551  ;;  %v253_v53 = vadd.f32 %v550_v50, %v548_v48  ;;  %517 = vst [vmem:[%s621_s21 + $0x8] sm:$0xf] %v392_v51 }
  0x28   : > { %v554_v54 = vpop.eup %553 }
  0x29   : > { %v254_v55 = vadd.f32 %v552_v52, %v253_v53 }
  0x2b   : > { %v255_v56 = vadd.f32 %v554_v54, %v254_v55 }
  0x2d   : > { %555 = vrcp.f32 %v255_v56  ;;  %v280_v56 = vld [vmem:[%s621_s21] sm:$0xf] }
  0x37   : > { %v556_v57 = vpop.eup %555 }
  0x38   : > { %v257_v58 = vmul.f32 %v556_v57, %v548_v48  ;;  %v258_v59 = vmul.f32 %v556_v57, %v550_v50  ;;  %v259_v60 = vmul.f32 %v556_v57, %v552_v52  ;;  %v260_v61 = vmul.f32 %v556_v57, %v554_v54  ;;  %v514_v54 = vld [vmem:[%s621_s21 + $0x4] sm:$0xf] }
  0x3a   : > { %v276_v62 = vsel %vm273_vm7, %v257_v58, 0.0  ;;  %v277_v63 = vsel %vm273_vm7, %v258_v59, 0.0  ;;  %v278_v0 = vsel %vm273_vm7, %v259_v60, 0.0  ;;  %v279_v1 = vsel %vm273_vm7, %v260_v61, 0.0 }
  0x3b   : > { %v281_v2 = vmul.f32 %v635_v8, %v276_v62  ;;  %v282_v3 = vmul.f32 %v637_v9, %v277_v63  ;;  %v283_v4 = vmul.f32 %v639_v11, %v278_v0  ;;  %v284_v6 = vmul.f32 %v641_v12, %v279_v1 }
  0x3c   : > { %v324_v7 = vrot.slane %v276_v62, 4  ;;  %v330_v10 = vrot.slane %v277_v63, 4  ;;  %v336_v13 = vrot.slane %v278_v0, 4  ;;  %v342_v5 = vrot.slane %v279_v1, 4 }
  0x3d   : > { %v285_v14 = vrot.slane %v281_v2, 4  ;;  %v291_v15 = vrot.slane %v282_v3, 4  ;;  %v297_v16 = vrot.slane %v283_v4, 4  ;;  %v303_v17 = vrot.slane %v284_v6, 4 }
  0x3e   : > { %v325_v18 = vadd.f32 %v324_v7, %v276_v62  ;;  %v331_v19 = vadd.f32 %v330_v10, %v277_v63  ;;  %v337_v20 = vadd.f32 %v336_v13, %v278_v0  ;;  %v343_v21 = vadd.f32 %v342_v5, %v279_v1 }
  0x3f   : > { %v286_v22 = vadd.f32 %v285_v14, %v281_v2  ;;  %v292_v8 = vadd.f32 %v291_v15, %v282_v3  ;;  %v298_v23 = vadd.f32 %v297_v16, %v283_v4  ;;  %v304_v9 = vadd.f32 %v303_v17, %v284_v6 }
  0x40   : > { %v326_v24 = vrot.slane %v325_v18, 2  ;;  %v332_v11 = vrot.slane %v331_v19, 2  ;;  %v338_v25 = vrot.slane %v337_v20, 2  ;;  %v344_v12 = vrot.slane %v343_v21, 2 }
  0x41   : > { %v287_v26 = vrot.slane %v286_v22, 2  ;;  %v293_v27 = vrot.slane %v292_v8, 2  ;;  %v299_v28 = vrot.slane %v298_v23, 2  ;;  %v305_v29 = vrot.slane %v304_v9, 2 }
  0x42   : > { %v327_v30 = vadd.f32 %v326_v24, %v325_v18  ;;  %v333_v31 = vadd.f32 %v332_v11, %v331_v19  ;;  %v339_v32 = vadd.f32 %v338_v25, %v337_v20  ;;  %v345_v33 = vadd.f32 %v344_v12, %v343_v21 }
  0x43   : > { %v288_v34 = vadd.f32 %v287_v26, %v286_v22  ;;  %v294_v35 = vadd.f32 %v293_v27, %v292_v8  ;;  %v300_v36 = vadd.f32 %v299_v28, %v298_v23  ;;  %v306_v37 = vadd.f32 %v305_v29, %v304_v9 }
  0x44   : > { %v328_v38 = vrot.slane %v327_v30, 1  ;;  %v334_v39 = vrot.slane %v333_v31, 1  ;;  %v340_v40 = vrot.slane %v339_v32, 1  ;;  %v346_v41 = vrot.slane %v345_v33, 1 }
  0x45   : > { %v289_v42 = vrot.slane %v288_v34, 1  ;;  %v295_v43 = vrot.slane %v294_v35, 1  ;;  %v301_v44 = vrot.slane %v300_v36, 1  ;;  %v307_v45 = vrot.slane %v306_v37, 1 }
  0x46   : > { %v329_v46 = vadd.f32 %v328_v38, %v327_v30  ;;  %v335_v47 = vadd.f32 %v334_v39, %v333_v31  ;;  %v341_v48 = vadd.f32 %v340_v40, %v339_v32  ;;  %v347_v49 = vadd.f32 %v346_v41, %v345_v33 }
  0x47   : > { %v290_v50 = vadd.f32 %v289_v42, %v288_v34  ;;  %v296_v51 = vadd.f32 %v295_v43, %v294_v35  ;;  %v302_v52 = vadd.f32 %v301_v44, %v300_v36  ;;  %v308_v53 = vadd.f32 %v307_v45, %v306_v37 }
  0x48   : > { %v352_v55 = vsel %vm313_vm4, %v335_v47, %v329_v46 }
  0x49   : > { %v314_v57 = vsel %vm313_vm4, %v296_v51, %v290_v50  ;;  %v353_v58 = vsel %vm315_vm5, %v341_v48, %v352_v55 }
  0x4a   : > { %v316_v59 = vsel %vm315_vm5, %v302_v52, %v314_v57  ;;  %v354_v60 = vsel %vm317_vm6, %v347_v49, %v353_v58 }
  0x4b   : > { %v318_v61 = vsel %vm317_vm6, %v308_v53, %v316_v59  ;;  %v356_v62 = vadd.f32 %v514_v54, %v354_v60 }
  0x4c   : > { %v320_v63 = vadd.f32 %v318_v61, %v280_v56 }
  0x4d   : > { %515 = vst [vmem:[%s621_s21 + $0x4] sm:$0xf] %v356_v62 }
  0x4e   : > { %321 = vst [vmem:[%s621_s21] sm:$0xf] %v320_v63 }
  0x4f PF: > { %s12_s11 = sadd.s32 1, %s579_s11   ;;  %s683_s9 = smov %s575_s10 }
  0x50   : > { %p9_p5 = scmp.ge.s32.totalorder %s12_s11, 4   ;;  %s684_s10 = smov %s686_s12 }
  0x52   :  { %11 = sbr.rel (!%p9_p5) target bundleno = 2 (0x2), region = 67 }

</bundles_post_ra>
